<compile_context>
chip_gen: v7x
topology: tpu7x:2x2x1
jax: 0.10.0
libtpu: 0.0.40
codegen_flags: <defaults>
</compile_context>

<pallas_src>
import functools

import jax
import jax.numpy as jnp
import numpy as np
from jax import lax
from jax.experimental import pallas as pl
from jax.experimental.pallas import tpu as pltpu


def _largest_divisor_leq(dim, target):
    """Largest tile size <= target that evenly divides dim."""
    t = max(1, min(dim, target))
    while dim % t:
        t -= 1
    return t


# ------------------ LayerNorm (optional) + per-token quant ---------------- #
def _act_quant_kernel(*refs, eps, qp, apply_ln):
    if apply_ln:
        x_ref, g_ref, b_ref, xq_ref, sx_ref = refs
    else:
        x_ref, xq_ref, sx_ref = refs

    x = x_ref[...].astype(jnp.float32)
    if apply_ln:
        mu = jnp.mean(x, axis=-1, keepdims=True)
        var = jnp.mean(jnp.square(x - mu), axis=-1, keepdims=True)
        x = (x - mu) * lax.rsqrt(var + eps) * g_ref[...] + b_ref[...]

    amax = jnp.maximum(jnp.max(jnp.abs(x), axis=-1, keepdims=True), 1e-6)
    s = amax / qp
    xq_ref[...] = jnp.round(x / s).astype(xq_ref.dtype)   # integers, exact in bf16
    sx_ref[...] = s


def act_quantize(x2d, gamma=None, beta=None, eps=1e-5, qp=127.0, tm_target=256):
    """Row-tiled pre-pass: (optional LayerNorm) + per-token symmetric quant.

    Returns (x_q bf16 (M, C), s_x f32 (M, 1)).
    """
    M, C = x2d.shape
    tm = _largest_divisor_leq(M, tm_target)
    apply_ln = gamma is not None

    inputs = [x2d.astype(jnp.float32)]
    in_specs = [pl.BlockSpec((tm, C), lambda i: (i, 0))]
    if apply_ln:
        inputs += [gamma.reshape(1, C).astype(jnp.float32),
                   beta.reshape(1, C).astype(jnp.float32)]
        in_specs += [pl.BlockSpec((1, C), lambda i: (0, 0)),
                     pl.BlockSpec((1, C), lambda i: (0, 0))]

    kernel = functools.partial(_act_quant_kernel, eps=float(eps), qp=float(qp),
                               apply_ln=apply_ln)
    xq, sx = pl.pallas_call(
        kernel,
        out_shape=(jax.ShapeDtypeStruct((M, C), jnp.bfloat16),
                   jax.ShapeDtypeStruct((M, 1), jnp.float32)),
        grid_spec=pltpu.PrefetchScalarGridSpec(
            num_scalar_prefetch=0,
            grid=(M // tm,),
            in_specs=in_specs,
            out_specs=[pl.BlockSpec((tm, C), lambda i: (i, 0)),
                       pl.BlockSpec((tm, 1), lambda i: (i, 0))],
        ),
        compiler_params=pltpu.CompilerParams(dimension_semantics=("parallel",)),
    )(*inputs)
    return xq, sx


# --------------------------- Quantized matmul ------------------------------ #
def _qmm_kernel(*refs, apply_gelu, has_residual):
    if has_residual:
        x_ref, s_ref, w_ref, b_ref, r_ref, o_ref, acc_ref = refs
    else:
        x_ref, s_ref, w_ref, b_ref, o_ref, acc_ref = refs
        r_ref = None

    k = pl.program_id(2)

    @pl.when(k == 0)
    def _():
        acc_ref[...] = jnp.zeros_like(acc_ref)

    # bf16 integer operands on the MXU, f32 accumulation (exact for |q|<=127).
    acc_ref[...] += jnp.dot(x_ref[...], w_ref[...],
                            preferred_element_type=jnp.float32)

    @pl.when(k == pl.num_programs(2) - 1)
    def _():
        # bias added BEFORE the rescale, matching the PyTorch reference.
        out = (acc_ref[...] + b_ref[...]) * s_ref[...]
        if apply_gelu:  # exact (erf) GELU, nn.GELU() default
            out = 0.5 * out * (1.0 + lax.erf(out * jnp.float32(0.7071067811865476)))
        if r_ref is not None:
            out = out + r_ref[...]
        o_ref[...] = out.astype(o_ref.dtype)


def quant_matmul(x_q, s_x, w_q_t, s_w, bias, residual=None, apply_gelu=False,
                 out_dtype=jnp.float32, tm_target=256, tn_target=256, tk_target=512):
    """out = (x_q @ w_q_t + bias) * (s_x * s_w) [ + gelu ] [ + residual ].

    x_q   : (M, K)  bf16 (rounded activations)
    s_x   : (M, 1)  f32  per-token scale
    w_q_t : (K, N)  bf16 (rounded weights, pre-transposed)
    s_w   : scalar  f32  per-tensor weight scale
    """
    M, K = x_q.shape
    Kw, Nout = w_q_t.shape
    assert K == Kw

    tm = _largest_divisor_leq(M, tm_target)
    tn = _largest_divisor_leq(Nout, tn_target)
    tk = _largest_divisor_leq(K, tk_target)
    grid = (M // tm, Nout // tn, K // tk)

    # Fold the static per-tensor weight scale into the per-row scale so the
    # kernel epilogue is a single fused multiply.
    scale_rows = (s_x * s_w).astype(jnp.float32).reshape(M, 1)
    bias2d = bias.reshape(1, Nout).astype(jnp.float32)

    inputs = [x_q.astype(jnp.bfloat16), scale_rows, w_q_t.astype(jnp.bfloat16), bias2d]
    in_specs = [
        pl.BlockSpec((tm, tk), lambda i, j, k: (i, k)),
        pl.BlockSpec((tm, 1), lambda i, j, k: (i, 0)),
        # weight tile independent of the M axis -> stays resident across row tiles
        pl.BlockSpec((tk, tn), lambda i, j, k: (k, j)),
        pl.BlockSpec((1, tn), lambda i, j, k: (0, j)),
    ]
    if residual is not None:
        inputs.append(residual.astype(jnp.float32))
        in_specs.append(pl.BlockSpec((tm, tn), lambda i, j, k: (i, j)))

    kernel = functools.partial(_qmm_kernel, apply_gelu=apply_gelu,
                               has_residual=residual is not None)
    return pl.pallas_call(
        kernel,
        out_shape=jax.ShapeDtypeStruct((M, Nout), out_dtype),
        grid_spec=pltpu.PrefetchScalarGridSpec(
            num_scalar_prefetch=0,
            grid=grid,
            in_specs=in_specs,
            out_specs=pl.BlockSpec((tm, tn), lambda i, j, k: (i, j)),
            scratch_shapes=[pltpu.VMEM((tm, tn), jnp.float32)],
        ),
        compiler_params=pltpu.CompilerParams(
            dimension_semantics=("parallel", "parallel", "arbitrary")),
    )(*inputs)


# ------------------------------ Attention ---------------------------------- #
def _attn_kernel(qkv_ref, o_ref, *, num_heads, head_dim, scale):
    C = num_heads * head_dim
    qkv = qkv_ref[...].astype(jnp.float32)        # (N, 3C) slab for one batch elem
    outs = []
    for h in range(num_heads):                     # static unroll over heads
        lo = h * head_dim
        q = qkv[:, lo:lo + head_dim] * scale
        k = qkv[:, C + lo:C + lo + head_dim]
        v = qkv[:, 2 * C + lo:2 * C + lo + head_dim]
        s = lax.dot_general(q, k, (((1,), (1,)), ((), ())),
                            preferred_element_type=jnp.float32)     # (N, N)
        m = jnp.max(s, axis=-1, keepdims=True)
        p = jnp.exp(s - m)
        p = p / jnp.sum(p, axis=-1, keepdims=True)
        outs.append(jnp.dot(p, v, preferred_element_type=jnp.float32))
    # single lane-dense (N, C) store (heads concatenated = PyTorch head layout)
    o_ref[...] = jnp.concatenate(outs, axis=-1).astype(o_ref.dtype)


def attention(qkv2d, B, N, num_heads, head_dim, scale):
    """qkv2d: (B*N, 3C) f32, tokens grouped per batch. Returns (B*N, C) f32."""
    C3 = qkv2d.shape[1]
    C = C3 // 3
    return pl.pallas_call(
        functools.partial(_attn_kernel, num_heads=num_heads,
                          head_dim=head_dim, scale=float(scale)),
        out_shape=jax.ShapeDtypeStruct((B * N, C), jnp.float32),
        grid_spec=pltpu.PrefetchScalarGridSpec(
            num_scalar_prefetch=0,
            grid=(B,),
            in_specs=[pl.BlockSpec((N, C3), lambda b: (b, 0))],
            out_specs=pl.BlockSpec((N, C), lambda b: (b, 0)),
        ),
        compiler_params=pltpu.CompilerParams(dimension_semantics=("parallel",)),
    )(qkv2d.astype(jnp.float32))


# ------------------ static weight quantization (hoisted) ------------------- #
def prepare_block_params(params, qp_w=127.0):
    """Quantize weights once (per_tensor, symmetric) and pre-transpose to (K, N)."""
    prepped = {k: v for k, v in params.items()}
    for name in ("qkv", "proj", "fc1", "fc2"):
        w = params[f"w_{name}"].astype(jnp.float32)           # (N_out, K)
        s_w = jnp.maximum(jnp.max(jnp.abs(w)), 1e-6) / qp_w
        prepped[f"wq_{name}"] = jnp.round(w / s_w).T.astype(jnp.bfloat16)  # (K, N_out)
        prepped[f"sw_{name}"] = s_w
    return prepped


# ---------------------------- Q_Block forward ------------------------------ #
def q_block_forward(x, prepped, num_heads):
    B, N, C = x.shape
    hd = C // num_heads
    scale = hd ** (-0.5)
    x2d = x.reshape(B * N, C).astype(jnp.float32)

    # norm1 (fused with act-quant) -> QKV -> attention -> proj (+residual)
    h_q, h_s = act_quantize(x2d, gamma=prepped["ln1_g"], beta=prepped["ln1_b"])
    qkv = quant_matmul(h_q, h_s, prepped["wq_qkv"], prepped["sw_qkv"], prepped["b_qkv"])
    a = attention(qkv, B, N, num_heads, hd, scale)                    # (B*N, C)
    a_q, a_s = act_quantize(a)
    x1 = quant_matmul(a_q, a_s, prepped["wq_proj"], prepped["sw_proj"],
                      prepped["b_proj"], residual=x2d)

    # norm2 (fused with act-quant) -> fc1 (+GELU) -> fc2 (+residual)
    g_q, g_s = act_quantize(x1, gamma=prepped["ln2_g"], beta=prepped["ln2_b"])
    hmid = quant_matmul(g_q, g_s, prepped["wq_fc1"], prepped["sw_fc1"],
                        prepped["b_fc1"], apply_gelu=True)
    m_q, m_s = act_quantize(hmid)
    out = quant_matmul(m_q, m_s, prepped["wq_fc2"], prepped["sw_fc2"],
                       prepped["b_fc2"], residual=x1)
    return out.reshape(B, N, C)


# ------------------- pure-JAX reference (semantics check) ------------------ #
def _ref_qlinear(x2d, w, b, Qp=127.0):
    wm = jnp.maximum(jnp.max(jnp.abs(w)), 1e-6)
    sw = wm / Qp
    wq = jnp.round(w / sw)
    xm = jnp.maximum(jnp.max(jnp.abs(x2d), axis=-1, keepdims=True), 1e-6)
    sx = xm / Qp
    xq = jnp.round(x2d / sx)
    return (xq @ wq.T + b) * (sx * sw)


def _ref_layernorm(x2d, g, b, eps=1e-5):
    m = jnp.mean(x2d, axis=-1, keepdims=True)
    v = jnp.mean(jnp.square(x2d - m), axis=-1, keepdims=True)
    return (x2d - m) / jnp.sqrt(v + eps) * g + b


def q_block_reference(x, params, num_heads):
    B, N, C = x.shape
    hd = C // num_heads
    scale = hd ** (-0.5)
    x2d = x.reshape(B * N, C).astype(jnp.float32)

    h = _ref_layernorm(x2d, params["ln1_g"], params["ln1_b"])
    qkv = _ref_qlinear(h, params["w_qkv"], params["b_qkv"])
    qkv = qkv.reshape(B, N, 3, num_heads, hd).transpose(2, 0, 3, 1, 4)
    q, k, v = qkv[0], qkv[1], qkv[2]
    attn = (q * scale) @ jnp.swapaxes(k, -2, -1)
    attn = jax.nn.softmax(attn, axis=-1)
    a = (attn @ v).transpose(0, 2, 1, 3).reshape(B * N, C)
    x1 = x2d + _ref_qlinear(a, params["w_proj"], params["b_proj"])

    h2 = _ref_layernorm(x1, params["ln2_g"], params["ln2_b"])
    h2 = _ref_qlinear(h2, params["w_fc1"], params["b_fc1"])
    h2 = jax.nn.gelu(h2, approximate=False)
    out = x1 + _ref_qlinear(h2, params["w_fc2"], params["b_fc2"])
    return out.reshape(B, N, C)


# -------------------------------- main -------------------------------------- #
if __name__ == "__main__":
    # Small shapes consistent with the module (dim=32, heads=4, mlp_ratio=4).
    B, N, C = 2, 8, 32
    num_heads = 4
    mlp_hidden = int(C * 4.0)

    key = jax.random.PRNGKey(0)
    ks = jax.random.split(key, 10)
    params = {
        "ln1_g": jnp.ones((C,), jnp.float32),
        "ln1_b": jnp.zeros((C,), jnp.float32),
        "ln2_g": jnp.ones((C,), jnp.float32),
        "ln2_b": jnp.zeros((C,), jnp.float32),
        "w_qkv": 0.05 * jax.random.normal(ks[0], (3 * C, C), jnp.float32),
        "b_qkv": 0.01 * jax.random.normal(ks[1], (3 * C,), jnp.float32),
        "w_proj": 0.05 * jax.random.normal(ks[2], (C, C), jnp.float32),
        "b_proj": 0.01 * jax.random.normal(ks[3], (C,), jnp.float32),
        "w_fc1": 0.05 * jax.random.normal(ks[4], (mlp_hidden, C), jnp.float32),
        "b_fc1": 0.01 * jax.random.normal(ks[5], (mlp_hidden,), jnp.float32),
        "w_fc2": 0.05 * jax.random.normal(ks[6], (C, mlp_hidden), jnp.float32),
        "b_fc2": 0.01 * jax.random.normal(ks[7], (C,), jnp.float32),
    }
    x = jax.random.normal(ks[8], (B, N, C), jnp.float32)

    prepped = jax.tree_util.tree_map(jax.block_until_ready, prepare_block_params(params))

    out = q_block_forward(x, prepped, num_heads)
    out = jax.block_until_ready(out)

    ref = jax.block_until_ready(q_block_reference(x, params, num_heads))
    assert out.shape == (B, N, C)
    assert np.all(np.isfinite(np.asarray(out)))
    np.testing.assert_allclose(np.asarray(out), np.asarray(ref), rtol=1e-3, atol=1e-3)

    # TODO(synk): probe()/matplotlib histogram side-effects, prefix_token_num>0
    # path and backward-pass gradient quantization are not inference hot path
    # and are omitted.
    print("KERNEL_OK")
</pallas_src>

<mosaic_0001>
module attributes {stable_mosaic.version = 11 : i64} {
  func.func @_act_quant_kernel(%arg0: i32, %arg1: memref<16x32xf32, #tpu.memory_space<vmem>>, %arg2: memref<1x32xf32, #tpu.memory_space<vmem>>, %arg3: memref<1x32xf32, #tpu.memory_space<vmem>>, %arg4: memref<16x32xbf16, #tpu.memory_space<vmem>>, %arg5: memref<16x1xf32, #tpu.memory_space<vmem>>) attributes {dimension_semantics = [#tpu.dimension_semantics<parallel>], iteration_bounds = array<i64: 1>, scalar_prefetch = 0 : i64, scratch_operands = 0 : i64, tpu.core_type = #tpu.core_type<tc>, window_params = [{transform_indices = @transform_0, window_bounds = array<i64: 16, 32>}, {pipeline_mode = #tpu.pipeline_mode<synchronous>, transform_indices = @transform_1, window_bounds = array<i64: 1, 32>}, {pipeline_mode = #tpu.pipeline_mode<synchronous>, transform_indices = @transform_2, window_bounds = array<i64: 1, 32>}, {transform_indices = @transform_3, window_bounds = array<i64: 16, 32>}, {transform_indices = @transform_4, window_bounds = array<i64: 16, 1>}]} {
    %c0 = arith.constant 0 : index
    %c0_0 = arith.constant 0 : index
    %0 = vector.load %arg1[%c0, %c0_0] : memref<16x32xf32, #tpu.memory_space<vmem>>, vector<16x32xf32>
    %cst = arith.constant dense<0.000000e+00> : vector<16xf32>
    %1 = vector.multi_reduction <add>, %0, %cst [1] : vector<16x32xf32> to vector<16xf32>
    %2 = vector.shape_cast %1 : vector<16xf32> to vector<16x1xf32>
    %cst_1 = arith.constant 3.200000e+01 : f32
    %3 = vector.broadcast %cst_1 : f32 to vector<16x1xf32>
    %4 = arith.divf %2, %3 : vector<16x1xf32>
    %5 = vector.broadcast %4 : vector<16x1xf32> to vector<16x32xf32>
    %6 = arith.subf %0, %5 : vector<16x32xf32>
    %7 = arith.mulf %6, %6 : vector<16x32xf32>
    %cst_2 = arith.constant dense<0.000000e+00> : vector<16xf32>
    %8 = vector.multi_reduction <add>, %7, %cst_2 [1] : vector<16x32xf32> to vector<16xf32>
    %9 = vector.shape_cast %8 : vector<16xf32> to vector<16x1xf32>
    %cst_3 = arith.constant 3.200000e+01 : f32
    %10 = vector.broadcast %cst_3 : f32 to vector<16x1xf32>
    %11 = arith.divf %9, %10 : vector<16x1xf32>
    %12 = vector.broadcast %4 : vector<16x1xf32> to vector<16x32xf32>
    %13 = arith.subf %0, %12 : vector<16x32xf32>
    %cst_4 = arith.constant 9.99999974E-6 : f32
    %14 = vector.broadcast %cst_4 : f32 to vector<16x1xf32>
    %15 = arith.addf %11, %14 : vector<16x1xf32>
    %16 = math.rsqrt %15 : vector<16x1xf32>
    %17 = vector.broadcast %16 : vector<16x1xf32> to vector<16x32xf32>
    %18 = arith.mulf %13, %17 : vector<16x32xf32>
    %c0_5 = arith.constant 0 : index
    %c0_6 = arith.constant 0 : index
    %19 = vector.load %arg2[%c0_5, %c0_6] : memref<1x32xf32, #tpu.memory_space<vmem>>, vector<1x32xf32>
    %20 = vector.broadcast %19 : vector<1x32xf32> to vector<16x32xf32>
    %21 = arith.mulf %18, %20 : vector<16x32xf32>
    %c0_7 = arith.constant 0 : index
    %c0_8 = arith.constant 0 : index
    %22 = vector.load %arg3[%c0_7, %c0_8] : memref<1x32xf32, #tpu.memory_space<vmem>>, vector<1x32xf32>
    %23 = vector.broadcast %22 : vector<1x32xf32> to vector<16x32xf32>
    %24 = arith.addf %21, %23 : vector<16x32xf32>
    %25 = math.absf %24 : vector<16x32xf32>
    %cst_9 = arith.constant dense<0xFF800000> : vector<16xf32>
    %26 = vector.multi_reduction <maximumf>, %25, %cst_9 [1] : vector<16x32xf32> to vector<16xf32>
    %27 = vector.shape_cast %26 : vector<16xf32> to vector<16x1xf32>
    %cst_10 = arith.constant 9.99999997E-7 : f32
    %28 = vector.broadcast %cst_10 : f32 to vector<16x1xf32>
    %29 = arith.maximumf %27, %28 : vector<16x1xf32>
    %cst_11 = arith.constant 1.270000e+02 : f32
    %30 = vector.broadcast %cst_11 : f32 to vector<16x1xf32>
    %31 = arith.divf %29, %30 : vector<16x1xf32>
    %32 = vector.broadcast %31 : vector<16x1xf32> to vector<16x32xf32>
    %33 = arith.divf %24, %32 : vector<16x32xf32>
    %34 = math.roundeven %33 : vector<16x32xf32>
    %35 = arith.truncf %34 : vector<16x32xf32> to vector<16x32xbf16>
    %c0_12 = arith.constant 0 : index
    %c0_13 = arith.constant 0 : index
    %36 = vector.load %arg4[%c0_12, %c0_13] : memref<16x32xbf16, #tpu.memory_space<vmem>>, vector<16x32xbf16>
    tpu.vector_store %arg4[%c0_12, %c0_13], %35 {strides = array<i32>} : memref<16x32xbf16, #tpu.memory_space<vmem>>, vector<16x32xbf16>,
    %c0_14 = arith.constant 0 : index
    %c0_15 = arith.constant 0 : index
    %37 = vector.load %arg5[%c0_14, %c0_15] : memref<16x1xf32, #tpu.memory_space<vmem>>, vector<16x1xf32>
    tpu.vector_store %arg5[%c0_14, %c0_15], %31 {strides = array<i32>} : memref<16x1xf32, #tpu.memory_space<vmem>>, vector<16x1xf32>,
    return
  }
  func.func @transform_0(%arg0: i32) -> (i32, i32) {
    %c0_i32 = arith.constant 0 : i32
    %c0_i32_0 = arith.constant 0 : i32
    return %arg0, %c0_i32 : i32, i32
  }
  func.func @transform_1(%arg0: i32) -> (i32, i32) {
    %c0_i32 = arith.constant 0 : i32
    %c0_i32_0 = arith.constant 0 : i32
    %c0_i32_1 = arith.constant 0 : i32
    return %c0_i32, %c0_i32_0 : i32, i32
  }
  func.func @transform_2(%arg0: i32) -> (i32, i32) {
    %c0_i32 = arith.constant 0 : i32
    %c0_i32_0 = arith.constant 0 : i32
    %c0_i32_1 = arith.constant 0 : i32
    return %c0_i32, %c0_i32_0 : i32, i32
  }
  func.func @transform_3(%arg0: i32) -> (i32, i32) {
    %c0_i32 = arith.constant 0 : i32
    %c0_i32_0 = arith.constant 0 : i32
    return %arg0, %c0_i32 : i32, i32
  }
  func.func @transform_4(%arg0: i32) -> (i32, i32) {
    %c0_i32 = arith.constant 0 : i32
    %c0_i32_0 = arith.constant 0 : i32
    return %arg0, %c0_i32 : i32, i32
  }
}

</mosaic_0001>

<bundles_post_ra>
// kernel: tpu_custom_call.1
= control target key start
LH: loop header
LB: loop body
LE: loop exit
PB: predicated region body
PF: predicated region fallthrough
CT: control target
= control target key end

     0   :  { %10 = vsyncpa [#allocation3], 0  ;;  %s276_s0 = inlined_call_operand.hbm [shape: f32[16,32], index: 0, kind: input, shape index: {}]   ;;  %s277_s1 = inlined_call_operand.vmem [shape: f32[1,32], index: 1, kind: input, shape index: {}]   ;;  %s278_s2 = inlined_call_operand.vmem [shape: f32[1,32], index: 2, kind: input, shape index: {}]   ;;  %s279_s3 = inlined_call_operand.hbm [shape: bf16[16,32], index: 3, kind: output, shape index: {0}]   ;;  %s280_s4 = inlined_call_operand.vmem [shape: f32[16,1], index: 4, kind: output, shape index: {1}]  }
   0x1   :  { %11 = vsyncpa [#allocation4], 0  ;;  %s203_s15 = smov [#allocation2]   ;;  %s155_s19 = scalar_lea.hbm %s276_s0, 256 }
   0x2   :  { %s17_s16 = sshll.u32 %s203_s15, 4  ;;  %p156_p0 = scmp.ne.s32.totalorder %s276_s0, %s155_s19  ;;  %s18_s16 = int_to_ptr.vmem [resolvable:$true] %s17_s16 }
   0x3   :  { %p159_p1 = scmp.lt.u32.totalorder %s155_s19, %s276_s0 }
   0x5   :  { %p161_p2 = pnand %p159_p1, %p156_p0 }
   0x7   :  { %164 = shalt.err (!%p161_p2)
}
   0x8   :  { %s165_s24 = scalar_lea.vmem %s18_s16, 256  ;;  %p170_p4 = scmp.lt.s32.totalorder %s18_s16, %s18_s16 }
   0x9   :  { %p166_p3 = scmp.ne.s32.totalorder %s18_s16, %s165_s24  ;;  %p171_p5 = scmp.lt.s32.totalorder %s165_s24, %s165_s24 }
   0xb   :  { %p172_p6 = por %p171_p5, %p170_p4 }
   0xd   :  { %p173_p7 = pnand %p172_p6, %p166_p3 }
   0xf   :  { %176 = shalt.err (!%p173_p7)
}
  0x10   :  { %s204_s25 = smov 128   ;;  %s205_s26 = smov 8  }
  0x11   :  { %23 = dma.hbm_to_vmem [thread:$0]  %s276_s0, 256, %s18_s16, [#allocation3], %s204_s25, %s204_s25, %s205_s26  }
  0x12   :  { %199 = dma.done.wait [#allocation3], 256  }
  0x13   :  { %200 = vsyncadd [#allocation3], 4294967040  ;;  %vm33_vm0 = vcmask 261120   ;;  %v31_v0 = vld [vmem:[#allocation2] sm:$0xff]  ;;  %v32_v1 = vld [vmem:[#allocation2 + $0x8] sm:$0xff]  ;;  %vm109_vm1 = vcmask 7168  }
  0x14   :  { %v34_v2 = vsel %vm33_vm0, %v31_v0, 0.0  ;;  %v37_v3 = vsel %vm33_vm0, %v32_v1, 0.0  ;;  %v133_v21 = vld [vmem:[%s277_s1] ss:$0 sm:$0xff]  ;;  %vm106_vm2 = vcmask 257024   ;;  %s206_s8 = smov [#allocation5]  }
  0x15   :  { %35 = vadd.xlane.f32.xlu0 %v34_v2  ;;  %v134_v23 = vld [vmem:[%s278_s2] ss:$0 sm:$0xff]  ;;  %s117_s9 = sshll.u32 %s206_s8, 4  ;;  %s118_s9 = int_to_ptr.vmem [resolvable:$true] %s117_s9 }
  0x16   :  { %s177_s10 = scalar_lea.vmem %s118_s9, 128  ;;  %p182_p9 = scmp.lt.s32.totalorder %s118_s9, %s118_s9 }
  0x17   :  { %p178_p8 = scmp.ne.s32.totalorder %s118_s9, %s177_s10  ;;  %p183_p10 = scmp.lt.s32.totalorder %s177_s10, %s177_s10 }
  0x19   :  { %38 = vadd.xlane.f32.xlu0 %v37_v3  ;;  %p184_p11 = por %p183_p10, %p182_p9 }
  0x1b   :  { %p185_p12 = pnand %p184_p11, %p178_p8 }
  0xa2   :  { %v36_v4 = vpop.xlane.xlu0 %35 }
  0xa3   :  { %v41_v5 = vmul.f32 0.03125, %v36_v4 }
  0xa5   :  { %v43_v6 = vsub.f32 %v31_v0, %v41_v5 }
  0xa6   :  { %v39_v7 = vpop.xlane.xlu0 %38 }
  0xa7   :  { %v42_v8 = vmul.f32 0.03125, %v39_v7  ;;  %v45_v9 = vmul.f32 %v43_v6, %v43_v6 }
  0xa9   :  { %v44_v10 = vsub.f32 %v32_v1, %v42_v8  ;;  %v47_v11 = vsel %vm33_vm0, %v45_v9, 0.0 }
  0xaa   :  { %48 = vadd.xlane.f32.xlu1 %v47_v11 }
  0xab   :  { %v46_v12 = vmul.f32 %v44_v10, %v44_v10 }
  0xad   :  { %v50_v13 = vsel %vm33_vm0, %v46_v12, 0.0 }
  0xae   :  { %51 = vadd.xlane.f32.xlu1 %v50_v13 }
 0x137   :  { %v49_v14 = vpop.xlane.xlu1 %48 }
 0x138   :  { %v53_v15 = vmul.f32 0.03125, %v49_v14 }
 0x13a   :  { %v55_v16 = vadd.f32 1e-05, %v53_v15 }
 0x13b   :  { %v52_v17 = vpop.xlane.xlu1 %51 }
 0x13c   :  { %147 = vrsqrt.f32 %v55_v16  ;;  %v54_v18 = vmul.f32 0.03125, %v52_v17 }
 0x13e   :  { %v56_v19 = vadd.f32 1e-05, %v54_v18 }
 0x140   :  { %149 = vrsqrt.f32 %v56_v19 }
 0x146   :  { %v148_v20 = vpop.eup %147 }
 0x147   :  { %v59_v22 = vmul.f32 %v148_v20, %v43_v6 }
 0x149   :  { %v68_v24 = vmul.f32 %v133_v21, %v59_v22 }
 0x14a   :  { %v150_v25 = vpop.eup %149 }
 0x14b   :  { %v77_v26 = vadd.f32 %v134_v23, %v68_v24  ;;  %v60_v27 = vmul.f32 %v150_v25, %v44_v10 }
 0x14d   :  { %v79_v28 = vand.u32 2147483647, %v77_v26  ;;  %v69_v29 = vmul.f32 %v133_v21, %v60_v27 }
 0x14f   :  { %v81_v30 = vsel %vm33_vm0, %v79_v28, -inf  ;;  %v78_v31 = vadd.f32 %v134_v23, %v69_v29 }
 0x150   :  { %82 = vmax.xlane.f32.xlu0 %v81_v30 }
 0x151   :  { %v80_v32 = vand.u32 2147483647, %v78_v31 }
 0x153   :  { %v84_v33 = vsel %vm33_vm0, %v80_v32, -inf }
 0x154   :  { %85 = vmax.xlane.f32.xlu1 %v84_v33 }
 0x1dd   :  { %v83_v34 = vpop.xlane.xlu0 %82 }
 0x1de   :  { %v87_v35 = vmax.f32 %v83_v34, 1e-06 }
 0x1e0   :  { %v90_v36 = vmul.f32 0.007874016, %v87_v35 }
 0x1e1   :  { %v86_v37 = vpop.xlane.xlu1 %85 }
 0x1e2   :  { %151 = vrcp.f32 %v90_v36  ;;  %110 = vst.msk [vmem:[%s280_s4] sm:$0xff] %vm109_vm1, %v90_v36  ;;  %v88_v38 = vmax.f32 %v86_v37, 1e-06 }
 0x1e4   :  { %v91_v39 = vmul.f32 0.007874016, %v88_v38 }
 0x1e6   :  { %153 = vrcp.f32 %v91_v39  ;;  %111 = vst.msk [vmem:[%s280_s4 + $0x8] sm:$0xff] %vm109_vm1, %v91_v39 }
 0x1ec   :  { %v152_v40 = vpop.eup %151 }
 0x1ed   :  { %v93_v41 = vmul.f32 %v152_v40, %v77_v26 }
 0x1ef   :  { %v139_v42 = vround.rtne.f32 %v93_v41 }
 0x1f0   :  { %v154_v43 = vpop.eup %153 }
 0x1f1   :  { %v95_v44 = vmul.f32 %v154_v43, %v78_v31  ;;  %v137_v45 = vpack.c.bf16 %v139_v42, %v139_v42 }
 0x1f3   :  { %v140_v46 = vround.rtne.f32 %v95_v44  ;;  %107 = vst.msk [vmem:[#allocation5] sm:$0xf] %vm106_vm2, %v137_v45 }
 0x1f5   :  { %v138_v47 = vpack.c.bf16 %v140_v46, %v140_v46 }
 0x1f7   :  { %108 = vst.msk [vmem:[#allocation5 + $0x4] sm:$0xf] %vm106_vm2, %v138_v47 }
 0x1f8   :  { %188 = shalt.err (!%p185_p12)
}
 0x1f9   :  { %s189_s12 = scalar_lea.hbm %s279_s3, 128 }
 0x1fa   :  { %p190_p13 = scmp.ne.s32.totalorder %s279_s3, %s189_s12  ;;  %p193_p0 = scmp.lt.u32.totalorder %s189_s12, %s279_s3 }
 0x1fc   :  { %p195_p1 = pnand %p193_p0, %p190_p13 }
 0x1fe   :  { %198 = shalt.err (!%p195_p1)
}
 0x1ff   :  { %s207_s17 = smov 64   ;;  %s208_s18 = smov 4  }
 0x200   :  { %123 = dma.vmem_to_hbm [thread:$0]  %s118_s9, 128, %s279_s3, [#allocation4], %s207_s17, %s207_s17, %s208_s18  }
 0x201   :  { %201 = dma.done.wait [#allocation4], 128  }
 0x202   :  { %202 = vsyncadd [#allocation4], 4294967168 }
 0x203   :  { %131 = vsyncpa [#allocation3], 1 }
 0x204   :  { %132 = vsyncpa [#allocation4], 1 }

</bundles_post_ra>
